<compile_context>
chip_gen: v7x
topology: tpu7x:2x2x1
jax: 0.10.0
libtpu: 0.0.40
codegen_flags: <defaults>
</compile_context>

<pallas_src>
import jax
import jax.numpy as jnp
from jax import lax
from jax.experimental import pallas as pl
from jax.experimental.pallas import tpu as pltpu


# --------------------------------------------------------------------------
# Config (mirrors the cfg dict of the PyTorch module, small synthetic sizes)
# --------------------------------------------------------------------------
CFG = dict(
    spatial_offset=7,     # spatial H = W = 2*7 + 1 = 15
    kernel_size=3,
    stride_cnn=2,
    input_size_cnn=4,     # in channels
    hidden_size=32,       # conv out channels
    dropout_rate=0.1,     # inference: identity (no scaling in eval mode)
)
BATCH = 2
LANES = 128               # lane-dense output slab width


# --------------------------------------------------------------------------
# Pallas kernel: one fused (folded) linear forward for the whole network
# --------------------------------------------------------------------------
def cnn_kernel(x_ref, w_ref, out_ref):
    # x_ref  : (B, CHW)   flattened f32 NCHW input (full array, single block)
    # w_ref  : (1, CHW)   effective folded weight (conv o flatten o dense, no bias)
    # out_ref: (B, LANES) lane-dense output slab; every lane of row b holds y[b]
    #
    # Dropout: eval-mode identity (PyTorch nn.Dropout is a no-op in eval).
    # TODO(synk): training-mode dropout (random mask + 1/(1-p) scale) is not
    # implemented; the whole-network weight fold is only valid in eval mode.
    y = jnp.sum(x_ref[...] * w_ref[...], axis=-1, keepdims=True)   # (B, 1)
    out_ref[...] = jnp.broadcast_to(y, out_ref.shape)              # one full-width store


# --------------------------------------------------------------------------
# One-time weight fold (run once per set of weights, NOT per forward call)
# --------------------------------------------------------------------------
def pack_weights(wc, bc, wd, bd, *, k, stride, H, W):
    """Fold Conv2d + flatten + Linear (eval-mode dropout = identity) into a single
    effective row vector w_eff[1, C*H*W] and scalar bias c_total, so that
        forward(x) == x.reshape(B, -1) @ w_eff.T + c_total."""
    Hd, C = wc.shape[0], wc.shape[1]
    OH = (H - k) // stride + 1
    OW = (W - k) // stride + 1
    wd_r = wd.reshape(Hd, OH, OW)   # flatten order of conv output is (Hd, OH, OW)

    # T[c, kh, kw, oi, oj] = sum_h wc[h, c, kh, kw] * wd_r[h, oi, oj]
    T = jnp.einsum("hckl,hij->cklij", wc, wd_r,
                   precision=lax.Precision.HIGHEST).astype(jnp.float32)

    # Scatter-add each kernel tap onto the input-image positions it touches.
    w_img = jnp.zeros((C, H, W), jnp.float32)
    for kh in range(k):
        for kw in range(k):
            w_img = w_img.at[:, kh:kh + stride * OH:stride,
                                kw:kw + stride * OW:stride].add(T[:, kh, kw])

    c_total = (jnp.einsum("hij,h->", wd_r, bc, precision=lax.Precision.HIGHEST)
               + bd.reshape(())).astype(jnp.float32)
    return w_img.reshape(1, C * H * W), c_total.reshape(1, 1)


# --------------------------------------------------------------------------
# Per-call forward (minimal wrapper; weights are pre-packed)
# --------------------------------------------------------------------------
@jax.jit
def cnn_forward(x, aux, w_row, c_total):
    """x: [B, C, H, W]; aux unused (signature parity with CNN.forward). -> [B, 1]."""
    del aux                                            # unused by the module's forward
    x = x.astype(jnp.float32)                          # inputs.float()
    B = x.shape[0]
    x_flat = x.reshape(B, -1)                          # (B, C*H*W), contiguous NCHW flatten

    out_slab = pl.pallas_call(
        cnn_kernel,
        out_shape=jax.ShapeDtypeStruct((B, LANES), jnp.float32),
        # No grid: single invocation, whole arrays as blocks in VMEM.
        in_specs=[
            pl.BlockSpec(memory_space=pltpu.MemorySpace.VMEM),
            pl.BlockSpec(memory_space=pltpu.MemorySpace.VMEM),
        ],
        out_specs=pl.BlockSpec(memory_space=pltpu.MemorySpace.VMEM),
    )(x_flat, w_row)

    # Folded conv bias + dense bias added outside the kernel (scalar).
    return out_slab[:, :1] + c_total                   # (B, 1)


# --------------------------------------------------------------------------
# Main
# --------------------------------------------------------------------------
if __name__ == "__main__":
    cfg = CFG
    k = cfg["kernel_size"]
    stride = cfg["stride_cnn"]
    C = cfg["input_size_cnn"]
    Hd = cfg["hidden_size"]
    S = 2 * cfg["spatial_offset"] + 1
    OH = OW = (S - k) // stride + 1
    F = Hd * OH * OW

    key = jax.random.PRNGKey(0)
    kx, kwc, kbc, kwd, kbd, kaux = jax.random.split(key, 6)

    # Deterministic synthetic parameters (shapes match nn.Conv2d / nn.Linear).
    wc = jax.random.normal(kwc, (Hd, C, k, k), jnp.float32) * 0.05   # conv weight
    bc = jax.random.normal(kbc, (Hd,), jnp.float32) * 0.05           # conv bias
    wd = jax.random.normal(kwd, (1, F), jnp.float32) * 0.05          # dense weight
    bd = jax.random.normal(kbd, (1,), jnp.float32) * 0.05            # dense bias

    # Inputs: NCHW, spatial = 2*spatial_offset + 1.  `aux` is unused by forward.
    x = jax.random.normal(kx, (BATCH, C, S, S), jnp.float32)
    aux = jax.random.normal(kaux, (BATCH, 4), jnp.float32)

    # One-time weight fold, hoisted out of the per-call path (per review).
    w_row, c_total = pack_weights(wc, bc, wd, bd, k=k, stride=stride, H=S, W=S)

    out = cnn_forward(x, aux, w_row, c_total)
    jax.block_until_ready(out)
    assert out.shape == (BATCH, 1) and out.dtype == jnp.float32

    # Cross-check against a pure-XLA reference of the original (un-folded) forward.
    conv_ref = lax.conv_general_dilated(
        x.astype(jnp.float32), wc, window_strides=(stride, stride), padding="VALID",
        dimension_numbers=("NCHW", "OIHW", "NCHW"),
        precision=lax.Precision.HIGHEST) + bc.reshape(1, Hd, 1, 1)
    ref = jnp.dot(conv_ref.reshape(BATCH, -1), wd.T,
                  precision=lax.Precision.HIGHEST) + bd.reshape(1, 1)
    err = float(jnp.max(jnp.abs(out - ref)))
    assert err < 1e-4, f"mismatch vs XLA reference: {err}"

    print("KERNEL_OK")
</pallas_src>

<mosaic_0001>
module attributes {stable_mosaic.version = 11 : i64} {
  func.func @cnn_kernel(%arg0: memref<2x900xf32, #tpu.memory_space<vmem>>, %arg1: memref<1x900xf32, #tpu.memory_space<vmem>>, %arg2: memref<2x128xf32, #tpu.memory_space<vmem>>) attributes {dimension_semantics = [], scalar_prefetch = 0 : i64, scratch_operands = 0 : i64, tpu.core_type = #tpu.core_type<tc>} {
    %c0 = arith.constant 0 : index
    %c0_0 = arith.constant 0 : index
    %0 = vector.load %arg0[%c0, %c0_0] : memref<2x900xf32, #tpu.memory_space<vmem>>, vector<2x900xf32>
    %c0_1 = arith.constant 0 : index
    %c0_2 = arith.constant 0 : index
    %1 = vector.load %arg1[%c0_1, %c0_2] : memref<1x900xf32, #tpu.memory_space<vmem>>, vector<1x900xf32>
    %2 = vector.broadcast %1 : vector<1x900xf32> to vector<2x900xf32>
    %3 = arith.mulf %0, %2 : vector<2x900xf32>
    %cst = arith.constant dense<0.000000e+00> : vector<2xf32>
    %4 = vector.multi_reduction <add>, %3, %cst [1] : vector<2x900xf32> to vector<2xf32>
    %5 = vector.shape_cast %4 : vector<2xf32> to vector<2x1xf32>
    %6 = vector.shape_cast %5 : vector<2x1xf32> to vector<2x1xf32>
    %7 = vector.broadcast %6 : vector<2x1xf32> to vector<2x128xf32>
    %c0_3 = arith.constant 0 : index
    %c0_4 = arith.constant 0 : index
    %8 = vector.load %arg2[%c0_3, %c0_4] : memref<2x128xf32, #tpu.memory_space<vmem>>, vector<2x128xf32>
    tpu.vector_store %arg2[%c0_3, %c0_4], %7 {strides = array<i32>} : memref<2x128xf32, #tpu.memory_space<vmem>>, vector<2x128xf32>,
    return
  }
}

</mosaic_0001>

<bundles_post_ra>
// kernel: cnn_forward.1
= control target key start
LH: loop header
LB: loop body
LE: loop exit
PB: predicated region body
PF: predicated region fallthrough
CT: control target
= control target key end

     0   :  { %v15_v0 = vlaneseq  ;;  %v154_v1 = vmov 1983009808   ;;  %vm129_vm0 = vcmask 1041408   ;;  %vm143_vm1 = vcmask 25600   ;;  %s189_s1 = inlined_call_operand.vmem [shape: f32[1,900], index: 1, kind: input, shape index: {}]   ;;  %s190_s0 = inlined_call_operand.vmem [shape: f32[2,900], index: 0, kind: input, shape index: {}]   ;;  %s191_s2 = inlined_call_operand.vmem [shape: f32[2,128], index: 2, kind: output, shape index: {}]  }
   0x1   :  { %v50_v2 = vunpack.c.l.s4 %v154_v1  ;;  %v13_v4 = vld [vmem:[%s189_s1] sm:$0xff]  ;;  %v12_v32 = vld [vmem:[%s190_s0 + $0x8] sm:$0xff] }
   0x2   :  { %v16_v3 = vshrl.u32 %v15_v0, 7  ;;  %v11_v29 = vld [vmem:[%s190_s0] sm:$0xff] }
   0x3   :  { %v51_v5 = vunpack.c.0.s8 %v50_v2 }
   0x4   :  { %v17_v6 = vsub.s32 0, %v16_v3  ;;  %v21_v7 = vsub.s32 1, %v16_v3  ;;  %v25_v8 = vsub.s32 2, %v16_v3  ;;  %v29_v9 = vsub.s32 3, %v16_v3 }
   0x5   :  { %v33_v10 = vsub.s32 4, %v16_v3  ;;  %v37_v11 = vsub.s32 5, %v16_v3  ;;  %v41_v12 = vsub.s32 6, %v16_v3  ;;  %v45_v13 = vsub.s32 7, %v16_v3 }
   0x6   :  { %v18_v14 = vrot.slane %v13_v4, %v17_v6  ;;  %v22_v15 = vrot.slane %v13_v4, %v21_v7  ;;  %v26_v16 = vrot.slane %v13_v4, %v25_v8  ;;  %v30_v17 = vrot.slane %v13_v4, %v29_v9 }
   0x7   :  { %v34_v18 = vrot.slane %v13_v4, %v33_v10  ;;  %v38_v19 = vrot.slane %v13_v4, %v37_v11  ;;  %v42_v20 = vrot.slane %v13_v4, %v41_v12  ;;  %v46_v21 = vrot.slane %v13_v4, %v45_v13 }
   0x8   :  { %v47_v22 = vcombine.low %v18_v14, %v22_v15  ;;  %v48_v23 = vcombine.low %v26_v16, %v30_v17  ;;  %v54_v24 = vsub.s32 %v51_v5, %v16_v3 }
   0x9   :  { %v64_v25 = vcombine.low %v34_v18, %v38_v19  ;;  %v65_v26 = vcombine.low %v42_v20, %v46_v21 }
   0xa   :  { %v55_v27 = vrot.slane %v47_v22, %v54_v24  ;;  %v62_v28 = vrot.slane %v48_v23, %v54_v24 }
   0xb   :  { %v72_v30 = vrot.slane %v64_v25, %v54_v24  ;;  %v79_v31 = vrot.slane %v65_v26, %v54_v24 }
   0xc   :  { %v63_v33 = vcombine.low %v55_v27, %v62_v28 }
   0xd   :  { %v80_v34 = vcombine.low %v72_v30, %v79_v31 }
   0xe   :  { %v83_v35 = vmul.f32 %v63_v33, %v11_v29 }
   0xf   :  { %v84_v36 = vmul.f32 %v80_v34, %v12_v32 }
  0x10   :  { %v87_v37 = vcombine.high %v83_v35, %v83_v35  ;;  %v94_v38 = vrot.slane %v83_v35, %v54_v24 }
  0x11   :  { %v104_v39 = vcombine.high %v84_v36, %v84_v36  ;;  %v111_v42 = vrot.slane %v84_v36, %v54_v24 }
  0x12   :  { %v101_v40 = vrot.slane %v87_v37, %v54_v24  ;;  %v102_v41 = vcombine.high %v94_v38, %v94_v38  ;;  %v130_v43 = vsel %vm129_vm0, %v94_v38, 0.0 }
  0x13   :  { %v118_v48 = vrot.slane %v104_v39, %v54_v24  ;;  %v119_v49 = vcombine.high %v111_v42, %v111_v42  ;;  %v137_v52 = vsel %vm129_vm0, %v111_v42, 0.0 }
  0x14   :  { %v103_v44 = vcombine.high %v101_v40, %v101_v40  ;;  %v131_v45 = vsel %vm129_vm0, %v102_v41, 0.0  ;;  %v133_v46 = vsel %vm129_vm0, %v101_v40, 0.0 }
  0x15   :  { %v132_v47 = vadd.f32 %v131_v45, %v130_v43  ;;  %v120_v54 = vcombine.high %v118_v48, %v118_v48  ;;  %v139_v55 = vsel %vm129_vm0, %v119_v49, 0.0  ;;  %v141_v57 = vsel %vm129_vm0, %v118_v48, 0.0 }
  0x16   :  { %v135_v50 = vsel %vm129_vm0, %v103_v44, 0.0 }
  0x17   :  { %v134_v51 = vadd.f32 %v133_v46, %v132_v47  ;;  %v144_v59 = vsel %vm143_vm1, %v120_v54, 0.0 }
  0x19   :  { %v136_v53 = vadd.f32 %v135_v50, %v134_v51 }
  0x1b   :  { %v138_v56 = vadd.f32 %v137_v52, %v136_v53 }
  0x1d   :  { %v140_v58 = vadd.f32 %v139_v55, %v138_v56 }
  0x1f   :  { %v142_v60 = vadd.f32 %v141_v57, %v140_v58 }
  0x21   :  { %v145_v61 = vadd.f32 %v144_v59, %v142_v60 }
  0x23   :  { %146 = vadd.xlane.f32.xlu0 %v145_v61 }
  0xb0   :  { %v147_v62 = vpop.xlane.xlu0 %146 }
  0xb1   :  { %148 = vst [vmem:[%s191_s2] sm:$0x3] %v147_v62 }

</bundles_post_ra>
